<compile_context>
chip_gen: v6e
topology: v6e:2x2x1
jax: 0.10.0
libtpu: 0.0.40
codegen_flags: <defaults>
</compile_context>

<pallas_src>
import functools

import jax
import jax.numpy as jnp
from jax.experimental import pallas as pl
from jax.experimental.pallas import tpu as pltpu


# ---------------------------------------------------------------------------
# Kernel
# ---------------------------------------------------------------------------
def actor_kernel(obs_ref, w0_ref, b0_ref, w1_ref, b1_ref, wh_ref, bh_ref,
                 out_ref, *, action_dim, log_std_min, log_std_max):
    """One batch-tile of the Actor forward pass (trunk MLP + fused dist-param head).

    All elementwise math stays in f32 (biases are added to the f32 MXU accumulators;
    ReLU / tanh / affine / exp run on the f32 VPU/EUP path -- required on v5e, free on
    v6e/v7x because those slots are idle next to the matmuls).
    """
    x = obs_ref[...]                                                   # [tb, Fp]

    # trunk: Linear -> ReLU -> Linear -> ReLU   (hidden_depth = 2)
    h = jnp.dot(x, w0_ref[...], preferred_element_type=jnp.float32) + b0_ref[...]
    h = jnp.maximum(h, 0.0)
    h = jnp.dot(h.astype(w1_ref.dtype), w1_ref[...],
                preferred_element_type=jnp.float32) + b1_ref[...]
    h = jnp.maximum(h, 0.0)

    # fused head: one [Hp, Op] matmul produces [mu | log_std | pad] in a single tile.
    y = jnp.dot(h.astype(wh_ref.dtype), wh_ref[...],
                preferred_element_type=jnp.float32) + bh_ref[...]      # [tb, Op]

    # log_std squash: tanh -> affine rescale into [log_std_min, log_std_max] -> exp.
    # Applied full-width (EUP ops are free next to the matmuls); a column mask then
    # keeps the mu half raw and puts std in the log_std half, so a single full-width,
    # lane-dense store is emitted.  tanh bounds the throwaway mu/pad columns, so the
    # extra exp cannot overflow.
    ls = jnp.tanh(y)
    ls = log_std_min + 0.5 * (log_std_max - log_std_min) * (ls + 1.0)
    std = jnp.exp(ls)
    col = jax.lax.broadcasted_iota(jnp.int32, y.shape, 1)
    out = jnp.where(col < action_dim, y, std)

    out_ref[...] = out.astype(out_ref.dtype)


# ---------------------------------------------------------------------------
# Host-side helpers
# ---------------------------------------------------------------------------
def _round_up(x, m):
    return (x + m - 1) // m * m


def _pad2(a, rows, cols):
    r, c = a.shape
    return jnp.pad(a, ((0, rows - r), (0, cols - c)))


def _pick_tb(batch, *, cap=256):
    """Batch tile (multiple of 8).  Small batches -> one grid step; large batches ->
    cap-sized tiles so the grid has >= 2 'parallel' steps (megacore-shardable on v7x)
    while keeping VMEM pressure modest at hidden_dim=1024 (cap 256, not 1024)."""
    b8 = _round_up(batch, 8)
    if b8 <= cap:
        return b8
    return cap


def _resident_spec(shape, buffer_count=None):
    """BlockSpec for a weight/bias that is the full array at every grid step.

    Pass buffer_count=1 at production sizes (e.g. hidden_dim=1024) to single-buffer
    the resident weights and halve their VMEM footprint; left off by default (the
    demo grid collapses to one step where buffering is moot)."""
    index_map = lambda i: (0,) * len(shape)
    if buffer_count is not None and hasattr(pl, "Buffered"):
        try:
            return pl.BlockSpec(shape, index_map,
                                pipeline_mode=pl.Buffered(buffer_count))
        except TypeError:   # older jax without the pipeline_mode kwarg
            pass
    return pl.BlockSpec(shape, index_map)


def _vmem_limit_bytes(tb, Fp, Hp, Op, cd_bytes, out_bytes):
    """Explicit scoped-VMEM sizing (review item): block footprint + headroom,
    clamped to [32 MiB, 64 MiB] so it is valid on v5e/v6e/v7x alike."""
    weight_bytes = (Fp * Hp + Hp * Hp + Hp * Op) * cd_bytes
    bias_bytes = (2 * Hp + Op) * 4
    resident = 2 * (weight_bytes + bias_bytes)            # default double-buffering
    streams = 2 * tb * (Fp * cd_bytes + Op * out_bytes)   # obs / out tiles (2 bufs)
    interm = 6 * tb * max(Hp, Op) * 4                     # f32 h / y / std temps
    est = 2 * (resident + streams + interm)               # generous headroom
    return int(min(max(est, 32 * 1024 * 1024), 64 * 1024 * 1024))


# ---------------------------------------------------------------------------
# Wrapper
# ---------------------------------------------------------------------------
def actor_forward(obs, params, log_std_bounds, *, tb=None, tb_cap=256,
                  compute_dtype=jnp.bfloat16, out_dtype=jnp.float32,
                  weight_buffer_count=None):
    """Returns (mu, std) of the SquashedNormal policy distribution.

    compute_dtype: MXU operand dtype (bf16 default; accumulation is always f32).
    out_dtype:     dtype of the fused [mu | std] store (f32 default).
    """
    B, F = obs.shape
    H = params["w0"].shape[1]
    A = params["w_mu"].shape[1]

    LANE = 128
    Fp = _round_up(F, LANE)
    Hp = _round_up(H, LANE)
    Op = _round_up(2 * A, LANE)

    if tb is None:
        tb = _pick_tb(B, cap=tb_cap)
    assert tb % 8 == 0, tb
    Bp = _round_up(B, tb)
    grid_steps = Bp // tb

    cd = jnp.dtype(compute_dtype)
    od = jnp.dtype(out_dtype)

    # Zero-pad every operand to lane-dense (128-multiple) widths.  Zero padding is
    # exact: padded obs columns / weight rows contribute 0 to every dot product, and
    # padded hidden columns are relu(0) = 0 feeding zero weight rows downstream.
    obs_p = _pad2(obs.astype(cd), Bp, Fp)
    w0 = _pad2(params["w0"].astype(cd), Fp, Hp)
    w1 = _pad2(params["w1"].astype(cd), Hp, Hp)
    w_head = jnp.concatenate([params["w_mu"], params["w_ls"]], axis=1)   # [H, 2A]
    wh = _pad2(w_head.astype(cd), Hp, Op)
    # Biases stay f32: they are added to the f32 MXU accumulators.
    b0 = _pad2(params["b0"].astype(jnp.float32), 1, Hp)
    b1 = _pad2(params["b1"].astype(jnp.float32), 1, Hp)
    b_head = jnp.concatenate([params["b_mu"], params["b_ls"]], axis=1)   # [1, 2A]
    bh = _pad2(b_head.astype(jnp.float32), 1, Op)

    log_std_min, log_std_max = log_std_bounds
    kernel = functools.partial(
        actor_kernel,
        action_dim=int(A),
        log_std_min=float(log_std_min),
        log_std_max=float(log_std_max),
    )

    resident = functools.partial(_resident_spec, buffer_count=weight_buffer_count)

    grid_spec = pltpu.PrefetchScalarGridSpec(
        num_scalar_prefetch=0,
        grid=(grid_steps,),
        in_specs=[
            pl.BlockSpec((tb, Fp), lambda i: (i, 0)),   # obs tile (batch-tiled)
            resident((Fp, Hp)), resident((1, Hp)),      # w0, b0   (resident)
            resident((Hp, Hp)), resident((1, Hp)),      # w1, b1   (resident)
            resident((Hp, Op)), resident((1, Op)),      # fused head w, b (resident)
        ],
        out_specs=pl.BlockSpec((tb, Op), lambda i: (i, 0)),   # lane-dense [mu|std|pad]
    )

    fused = pl.pallas_call(
        kernel,
        out_shape=jax.ShapeDtypeStruct((Bp, Op), od),
        grid_spec=grid_spec,
        compiler_params=pltpu.CompilerParams(
            dimension_semantics=("parallel",),
            vmem_limit_bytes=_vmem_limit_bytes(tb, Fp, Hp, Op,
                                               cd.itemsize, od.itemsize),
        ),
    )(obs_p, w0, b0, w1, b1, wh, bh)

    mu = fused[:B, :A]
    std = fused[:B, A:2 * A]
    return mu, std


# ---------------------------------------------------------------------------
# Reference + init
# ---------------------------------------------------------------------------
def reference_forward(obs, params, log_std_bounds):
    """Plain-JAX reference mirroring the PyTorch forward."""
    h = jnp.maximum(obs @ params["w0"] + params["b0"], 0.0)
    h = jnp.maximum(h @ params["w1"] + params["b1"], 0.0)
    mu = h @ params["w_mu"] + params["b_mu"]
    log_std = h @ params["w_ls"] + params["b_ls"]
    log_std = jnp.tanh(log_std)
    lo, hi = log_std_bounds
    log_std = lo + 0.5 * (hi - lo) * (log_std + 1.0)
    return mu, jnp.exp(log_std)


def init_params(key, feature_dim, hidden_dim, action_dim):
    """Deterministic synthetic init (stand-in for U.weight_init / orthogonal)."""
    ks = jax.random.split(key, 6)
    scale = lambda fan_in: 1.0 / jnp.sqrt(jnp.float32(fan_in))
    return {
        "w0": jax.random.normal(ks[0], (feature_dim, hidden_dim), jnp.float32) * scale(feature_dim),
        "b0": jnp.zeros((1, hidden_dim), jnp.float32),
        "w1": jax.random.normal(ks[1], (hidden_dim, hidden_dim), jnp.float32) * scale(hidden_dim),
        "b1": jnp.zeros((1, hidden_dim), jnp.float32),
        "w_mu": jax.random.normal(ks[2], (hidden_dim, action_dim), jnp.float32) * scale(hidden_dim),
        "b_mu": jnp.zeros((1, action_dim), jnp.float32),
        "w_ls": jax.random.normal(ks[3], (hidden_dim, action_dim), jnp.float32) * scale(hidden_dim),
        "b_ls": jnp.zeros((1, action_dim), jnp.float32),
    }


if __name__ == "__main__":
    key = jax.random.PRNGKey(0)
    k_obs, k_params = jax.random.split(key)

    B = 16            # batch
    FEATURE_DIM = 32  # encoder.feature_dim (identity/state encoder)
    HIDDEN_DIM = 32   # hidden_dim
    ACTION_DIM = 4    # action_shape[0]  -> trunk output is 2 * ACTION_DIM
    LOG_STD_BOUNDS = (-10.0, 2.0)

    obs = jax.random.normal(k_obs, (B, FEATURE_DIM), jnp.float32)
    params = init_params(k_params, FEATURE_DIM, HIDDEN_DIM, ACTION_DIM)

    mu_ref, std_ref = reference_forward(obs, params, LOG_STD_BOUNDS)

    # 1) f32 MXU path, single grid step, lane-dense padded shapes: tight tolerance.
    mu, std = actor_forward(obs, params, LOG_STD_BOUNDS, compute_dtype=jnp.float32)
    jax.block_until_ready((mu, std))
    assert mu.shape == (B, ACTION_DIM) and std.shape == (B, ACTION_DIM)
    assert jnp.allclose(mu, mu_ref, atol=1e-5, rtol=1e-5)
    assert jnp.allclose(std, std_ref, atol=1e-5, rtol=1e-5)
    assert bool(jnp.all(std > 0))

    # 2) default path: bf16 MXU operands, f32 accumulation + f32 squash math.
    mu_bf, std_bf = actor_forward(obs, params, LOG_STD_BOUNDS)
    jax.block_until_ready((mu_bf, std_bf))
    assert jnp.allclose(mu_bf, mu_ref, atol=1e-1, rtol=1e-1)
    assert jnp.allclose(std_bf, std_ref, atol=1e-1, rtol=1e-1)
    assert bool(jnp.all(std_bf > 0))

    # 3) multi-step grid (explicit tb=8 -> 2 'parallel' grid steps), f32 path.
    mu_t, std_t = actor_forward(obs, params, LOG_STD_BOUNDS, tb=8,
                                compute_dtype=jnp.float32)
    jax.block_until_ready((mu_t, std_t))
    assert jnp.allclose(mu_t, mu_ref, atol=1e-5, rtol=1e-5)
    assert jnp.allclose(std_t, std_ref, atol=1e-5, rtol=1e-5)

    # 4) ragged batch (B=12 -> sublane-padded to 16 rows) + bf16 output store.
    obs_r = obs[:12]
    mu_r_ref, std_r_ref = reference_forward(obs_r, params, LOG_STD_BOUNDS)
    mu_r, std_r = actor_forward(obs_r, params, LOG_STD_BOUNDS,
                                compute_dtype=jnp.float32,
                                out_dtype=jnp.bfloat16)
    jax.block_until_ready((mu_r, std_r))
    assert mu_r.shape == (12, ACTION_DIM) and mu_r.dtype == jnp.bfloat16
    assert jnp.allclose(mu_r.astype(jnp.float32), mu_r_ref, atol=2e-2, rtol=2e-2)
    assert jnp.allclose(std_r.astype(jnp.float32), std_r_ref, atol=2e-2, rtol=2e-2)
    assert bool(jnp.all(std_r.astype(jnp.float32) > 0))

    print("KERNEL_OK")
</pallas_src>

<mosaic_0001>
module attributes {stable_mosaic.version = 11 : i64} {
  func.func @actor_kernel(%arg0: i32, %arg1: memref<16x128xf32, #tpu.memory_space<vmem>>, %arg2: memref<128x128xf32, #tpu.memory_space<vmem>>, %arg3: memref<1x128xf32, #tpu.memory_space<vmem>>, %arg4: memref<128x128xf32, #tpu.memory_space<vmem>>, %arg5: memref<1x128xf32, #tpu.memory_space<vmem>>, %arg6: memref<128x128xf32, #tpu.memory_space<vmem>>, %arg7: memref<1x128xf32, #tpu.memory_space<vmem>>, %arg8: memref<16x128xf32, #tpu.memory_space<vmem>>) attributes {dimension_semantics = [#tpu.dimension_semantics<parallel>], iteration_bounds = array<i64: 1>, scalar_prefetch = 0 : i64, scratch_operands = 0 : i64, tpu.core_type = #tpu.core_type<tc>, window_params = [{transform_indices = @transform_0, window_bounds = array<i64: 16, 128>}, {pipeline_mode = #tpu.pipeline_mode<synchronous>, transform_indices = @transform_1, window_bounds = array<i64: 128, 128>}, {pipeline_mode = #tpu.pipeline_mode<synchronous>, transform_indices = @transform_2, window_bounds = array<i64: 1, 128>}, {pipeline_mode = #tpu.pipeline_mode<synchronous>, transform_indices = @transform_3, window_bounds = array<i64: 128, 128>}, {pipeline_mode = #tpu.pipeline_mode<synchronous>, transform_indices = @transform_4, window_bounds = array<i64: 1, 128>}, {pipeline_mode = #tpu.pipeline_mode<synchronous>, transform_indices = @transform_5, window_bounds = array<i64: 128, 128>}, {pipeline_mode = #tpu.pipeline_mode<synchronous>, transform_indices = @transform_6, window_bounds = array<i64: 1, 128>}, {transform_indices = @transform_7, window_bounds = array<i64: 16, 128>}]} {
    %c0 = arith.constant 0 : index
    %c0_0 = arith.constant 0 : index
    %0 = vector.load %arg1[%c0, %c0_0] : memref<16x128xf32, #tpu.memory_space<vmem>>, vector<16x128xf32>
    %c0_1 = arith.constant 0 : index
    %c0_2 = arith.constant 0 : index
    %1 = vector.load %arg2[%c0_1, %c0_2] : memref<128x128xf32, #tpu.memory_space<vmem>>, vector<128x128xf32>
    %cst = arith.constant dense<0.000000e+00> : vector<16x128xf32>
    %2 = tpu.matmul %0, %1, %cst {dimension_numbers = #tpu.dot_dimension_numbers<[1], [0], [0], [1], [0, 0, 1, 1], [], []>} : vector<16x128xf32>, vector<128x128xf32>, vector<16x128xf32> -> vector<16x128xf32>
    %c0_3 = arith.constant 0 : index
    %c0_4 = arith.constant 0 : index
    %3 = vector.load %arg3[%c0_3, %c0_4] : memref<1x128xf32, #tpu.memory_space<vmem>>, vector<1x128xf32>
    %4 = vector.broadcast %3 : vector<1x128xf32> to vector<16x128xf32>
    %5 = arith.addf %2, %4 : vector<16x128xf32>
    %cst_5 = arith.constant 0.000000e+00 : f32
    %6 = vector.broadcast %cst_5 : f32 to vector<16x128xf32>
    %7 = arith.maximumf %5, %6 : vector<16x128xf32>
    %c0_6 = arith.constant 0 : index
    %c0_7 = arith.constant 0 : index
    %8 = vector.load %arg4[%c0_6, %c0_7] : memref<128x128xf32, #tpu.memory_space<vmem>>, vector<128x128xf32>
    %cst_8 = arith.constant dense<0.000000e+00> : vector<16x128xf32>
    %9 = tpu.matmul %7, %8, %cst_8 {dimension_numbers = #tpu.dot_dimension_numbers<[1], [0], [0], [1], [0, 0, 1, 1], [], []>} : vector<16x128xf32>, vector<128x128xf32>, vector<16x128xf32> -> vector<16x128xf32>
    %c0_9 = arith.constant 0 : index
    %c0_10 = arith.constant 0 : index
    %10 = vector.load %arg5[%c0_9, %c0_10] : memref<1x128xf32, #tpu.memory_space<vmem>>, vector<1x128xf32>
    %11 = vector.broadcast %10 : vector<1x128xf32> to vector<16x128xf32>
    %12 = arith.addf %9, %11 : vector<16x128xf32>
    %cst_11 = arith.constant 0.000000e+00 : f32
    %13 = vector.broadcast %cst_11 : f32 to vector<16x128xf32>
    %14 = arith.maximumf %12, %13 : vector<16x128xf32>
    %c0_12 = arith.constant 0 : index
    %c0_13 = arith.constant 0 : index
    %15 = vector.load %arg6[%c0_12, %c0_13] : memref<128x128xf32, #tpu.memory_space<vmem>>, vector<128x128xf32>
    %cst_14 = arith.constant dense<0.000000e+00> : vector<16x128xf32>
    %16 = tpu.matmul %14, %15, %cst_14 {dimension_numbers = #tpu.dot_dimension_numbers<[1], [0], [0], [1], [0, 0, 1, 1], [], []>} : vector<16x128xf32>, vector<128x128xf32>, vector<16x128xf32> -> vector<16x128xf32>
    %c0_15 = arith.constant 0 : index
    %c0_16 = arith.constant 0 : index
    %17 = vector.load %arg7[%c0_15, %c0_16] : memref<1x128xf32, #tpu.memory_space<vmem>>, vector<1x128xf32>
    %18 = vector.broadcast %17 : vector<1x128xf32> to vector<16x128xf32>
    %19 = arith.addf %16, %18 : vector<16x128xf32>
    %20 = math.tanh %19 : vector<16x128xf32>
    %cst_17 = arith.constant 1.000000e+00 : f32
    %21 = vector.broadcast %cst_17 : f32 to vector<16x128xf32>
    %22 = arith.addf %20, %21 : vector<16x128xf32>
    %cst_18 = arith.constant 6.000000e+00 : f32
    %23 = vector.broadcast %cst_18 : f32 to vector<16x128xf32>
    %24 = arith.mulf %23, %22 : vector<16x128xf32>
    %cst_19 = arith.constant -1.000000e+01 : f32
    %25 = vector.broadcast %cst_19 : f32 to vector<16x128xf32>
    %26 = arith.addf %25, %24 : vector<16x128xf32>
    %27 = math.exp %26 : vector<16x128xf32>
    %28 = tpu.iota {dimensions = array<i32: 1>} : vector<16x128xi32>
    %c4_i32 = arith.constant 4 : i32
    %29 = vector.broadcast %c4_i32 : i32 to vector<16x128xi32>
    %30 = arith.cmpi slt, %28, %29 : vector<16x128xi32>
    %31 = arith.select %30, %19, %27 : vector<16x128xi1>, vector<16x128xf32>
    %c0_20 = arith.constant 0 : index
    %c0_21 = arith.constant 0 : index
    %32 = vector.load %arg8[%c0_20, %c0_21] : memref<16x128xf32, #tpu.memory_space<vmem>>, vector<16x128xf32>
    tpu.vector_store %arg8[%c0_20, %c0_21], %31 {strides = array<i32>} : memref<16x128xf32, #tpu.memory_space<vmem>>, vector<16x128xf32>,
    return
  }
  func.func @transform_0(%arg0: i32) -> (i32, i32) {
    %c0_i32 = arith.constant 0 : i32
    %c0_i32_0 = arith.constant 0 : i32
    return %arg0, %c0_i32 : i32, i32
  }
  func.func @transform_1(%arg0: i32) -> (i32, i32) {
    %c0_i32 = arith.constant 0 : i32
    %c0_i32_0 = arith.constant 0 : i32
    %c0_i32_1 = arith.constant 0 : i32
    return %c0_i32, %c0_i32_0 : i32, i32
  }
  func.func @transform_2(%arg0: i32) -> (i32, i32) {
    %c0_i32 = arith.constant 0 : i32
    %c0_i32_0 = arith.constant 0 : i32
    %c0_i32_1 = arith.constant 0 : i32
    return %c0_i32, %c0_i32_0 : i32, i32
  }
  func.func @transform_3(%arg0: i32) -> (i32, i32) {
    %c0_i32 = arith.constant 0 : i32
    %c0_i32_0 = arith.constant 0 : i32
    %c0_i32_1 = arith.constant 0 : i32
    return %c0_i32, %c0_i32_0 : i32, i32
  }
  func.func @transform_4(%arg0: i32) -> (i32, i32) {
    %c0_i32 = arith.constant 0 : i32
    %c0_i32_0 = arith.constant 0 : i32
    %c0_i32_1 = arith.constant 0 : i32
    return %c0_i32, %c0_i32_0 : i32, i32
  }
  func.func @transform_5(%arg0: i32) -> (i32, i32) {
    %c0_i32 = arith.constant 0 : i32
    %c0_i32_0 = arith.constant 0 : i32
    %c0_i32_1 = arith.constant 0 : i32
    return %c0_i32, %c0_i32_0 : i32, i32
  }
  func.func @transform_6(%arg0: i32) -> (i32, i32) {
    %c0_i32 = arith.constant 0 : i32
    %c0_i32_0 = arith.constant 0 : i32
    %c0_i32_1 = arith.constant 0 : i32
    return %c0_i32, %c0_i32_0 : i32, i32
  }
  func.func @transform_7(%arg0: i32) -> (i32, i32) {
    %c0_i32 = arith.constant 0 : i32
    %c0_i32_0 = arith.constant 0 : i32
    return %arg0, %c0_i32 : i32, i32
  }
}

</mosaic_0001>

<bundles_post_ra>
// kernel: tpu_custom_call.1
= control target key start
LH: loop header
LB: loop body
LE: loop exit
PB: predicated region body
PF: predicated region fallthrough
CT: control target
= control target key end

     0   :  { %12 = vsyncpa [#allocation3], 0  ;;  %s791_s0 = inlined_call_operand.hbm [shape: f32[16,128], index: 0, kind: input, shape index: {}]   ;;  %s792_s1 = inlined_call_operand.hbm [shape: f32[128,128], index: 1, kind: input, shape index: {}]   ;;  %s793_s2 = inlined_call_operand.vmem [shape: f32[1,128], index: 2, kind: input, shape index: {}]   ;;  %s794_s3 = inlined_call_operand.hbm [shape: f32[128,128], index: 3, kind: input, shape index: {}]   ;;  %s795_s4 = inlined_call_operand.vmem [shape: f32[1,128], index: 4, kind: input, shape index: {}]   ;;  %s796_s5 = inlined_call_operand.hbm [shape: f32[128,128], index: 5, kind: input, shape index: {}]   ;;  %s797_s6 = inlined_call_operand.vmem [shape: f32[1,128], index: 6, kind: input, shape index: {}]   ;;  %s798_s7 = inlined_call_operand.hbm [shape: f32[16,128], index: 7, kind: output, shape index: {}]  }
   0x1   :  { %13 = vsyncpa [#allocation6], 0 }
   0x2   :  { %14 = vsyncpa [#allocation9], 0 }
   0x3   :  { %15 = vsyncpa [#allocation4], 0  ;;  %s705_s24 = smov [#allocation5]   ;;  %s706_s26 = smov [#allocation2]  }
   0x4   :  { %s33_s25 = sshll.u32 %s705_s24, 4  ;;  %s21_s27 = sshll.u32 %s706_s26, 4  ;;  %s34_s25 = int_to_ptr.vmem [resolvable:$true] %s33_s25  ;;  %s22_s27 = int_to_ptr.vmem [resolvable:$true] %s21_s27 }
   0x5   :  { %s605_s28 = scalar_lea.vmem %s34_s25, 2048  ;;  %p610_p1 = scmp.lt.s32.totalorder %s34_s25, %s34_s25 }
   0x6   :  { %p606_p0 = scmp.ne.s32.totalorder %s34_s25, %s605_s28  ;;  %p611_p2 = scmp.lt.s32.totalorder %s605_s28, %s605_s28 }
   0x8   :  { %p612_p3 = por %p611_p2, %p610_p1 }
   0xa   :  { %p613_p4 = pnand %p612_p3, %p606_p0 }
   0xc   :  { %616 = shalt.err (!%p613_p4)
}
   0xd   :  { %s707_s29 = smov 128   ;;  %s708_s30 = smov 8  }
   0xe   :  { %39 = dma.hbm_to_vmem [thread:$0]  %s792_s1, 2048, %s34_s25, [#allocation6], %s707_s29, %s707_s29, %s708_s30  }
   0xf   :  { %s625_s10 = scalar_lea.vmem %s22_s27, 256  ;;  %p630_p6 = scmp.lt.s32.totalorder %s22_s27, %s22_s27 }
  0x10   :  { %p626_p5 = scmp.ne.s32.totalorder %s22_s27, %s625_s10  ;;  %p631_p7 = scmp.lt.s32.totalorder %s625_s10, %s625_s10 }
  0x12   :  { %p632_p8 = por %p631_p7, %p630_p6 }
  0x14   :  { %p633_p9 = pnand %p632_p8, %p626_p5 }
  0x16   :  { %636 = shalt.err (!%p633_p9)
}
  0x17   :  { %27 = dma.hbm_to_vmem [thread:$0]  %s791_s0, 256, %s22_s27, [#allocation3], %s707_s29, %s707_s29, %s708_s30  }
  0x18   :  { %s709_s13 = smov [#allocation7]   ;;  %s710_s15 = smov [#allocation8]  }
  0x19   :  { %s47_s14 = sshll.u32 %s709_s13, 4  ;;  %s61_s16 = sshll.u32 %s710_s15, 4  ;;  %s48_s14 = int_to_ptr.vmem [resolvable:$true] %s47_s14  ;;  %s62_s16 = int_to_ptr.vmem [resolvable:$true] %s61_s16 }
  0x1a   :  { %s645_s1 = scalar_lea.vmem %s48_s14, 2048  ;;  %p650_p11 = scmp.lt.s32.totalorder %s48_s14, %s48_s14 }
  0x1b   :  { %p646_p10 = scmp.ne.s32.totalorder %s48_s14, %s645_s1  ;;  %p651_p12 = scmp.lt.s32.totalorder %s645_s1, %s645_s1 }
  0x1d   :  { %p652_p13 = por %p651_p12, %p650_p11 }
  0x1f   :  { %p653_p0 = pnand %p652_p13, %p646_p10 }
  0x21   :  { %656 = shalt.err (!%p653_p0)
}
  0x22   :  { %53 = dma.hbm_to_vmem [thread:$0]  %s794_s3, 2048, %s48_s14, [#allocation6], %s707_s29, %s707_s29, %s708_s30  }
  0x23   :  { %s665_s0 = scalar_lea.vmem %s62_s16, 2048  ;;  %p670_p2 = scmp.lt.s32.totalorder %s62_s16, %s62_s16 }
  0x24   :  { %p666_p1 = scmp.ne.s32.totalorder %s62_s16, %s665_s0  ;;  %p671_p3 = scmp.lt.s32.totalorder %s665_s0, %s665_s0 }
  0x26   :  { %p672_p4 = por %p671_p3, %p670_p2 }
  0x28   :  { %p673_p5 = pnand %p672_p4, %p666_p1 }
  0x2a   :  { %676 = shalt.err (!%p673_p5)
}
  0x2b   :  { %67 = dma.hbm_to_vmem [thread:$0]  %s796_s5, 2048, %s62_s16, [#allocation9], %s707_s29, %s707_s29, %s708_s30  }
  0x2c   :  { %697 = dma.done.wait [#allocation3], 256  }
  0x2d   :  { %698 = vsyncadd [#allocation3], 4294967040 }
  0x2e   :  { %699 = dma.done.wait [#allocation6], 4096  }
  0x2f   :  { %700 = vsyncadd [#allocation6], 4294963200 }
  0x30   :  { %701 = dma.done.wait [#allocation9], 2048  }
  0x31   :  { %702 = vsyncadd [#allocation9], 4294965248  ;;  %v99_v0 = vld [vmem:[#allocation5 + $0x78] sm:$0xff]  ;;  %v98_v1 = vld [vmem:[#allocation5 + $0x70] sm:$0xff] }
  0x32   :  { %477 = vmatprep.subr.mxu0 %v99_v0  ;;  %v97_v2 = vld [vmem:[#allocation5 + $0x68] sm:$0xff]  ;;  %v96_v3 = vld [vmem:[#allocation5 + $0x60] sm:$0xff]  ;;  %v82_v4 = vld [vmem:[#allocation2] sm:$0xff] }
  0x33   :  { %478 = vmatpush3.msra.mxu0 %v99_v0  ;;  %v95_v5 = vld [vmem:[#allocation5 + $0x58] sm:$0xff]  ;;  %509 = vmatprep.mubr.f32.mxu0 %v82_v4  ;;  %v198_v7 = vld [vmem:[#allocation7 + $0x70] sm:$0xff]  ;;  %v197_v9 = vld [vmem:[#allocation7 + $0x68] sm:$0xff] }
  0x34   :  { %479 = vmatprep.subr.mxu0 %v98_v1  ;;  %v199_v6 = vld [vmem:[#allocation7 + $0x78] sm:$0xff]  ;;  %v94_v8 = vld [vmem:[#allocation5 + $0x50] sm:$0xff]  ;;  %v93_v10 = vld [vmem:[#allocation5 + $0x48] sm:$0xff] }
  0x35   :  { %480 = vmatpush3.msra.mxu0 %v98_v1  ;;  %512 = vmatprep.subr.mxu1 %v199_v6  ;;  %v196_v11 = vld [vmem:[#allocation7 + $0x60] sm:$0xff]  ;;  %v195_v13 = vld [vmem:[#allocation7 + $0x58] sm:$0xff]  ;;  %v194_v15 = vld [vmem:[#allocation7 + $0x50] sm:$0xff] }
  0x36   :  { %481 = vmatprep.subr.mxu0 %v97_v2  ;;  %513 = vmatpush3.msra.mxu1 %v199_v6  ;;  %v92_v12 = vld [vmem:[#allocation5 + $0x40] sm:$0xff]  ;;  %v91_v14 = vld [vmem:[#allocation5 + $0x38] sm:$0xff]  ;;  %v90_v16 = vld [vmem:[#allocation5 + $0x30] sm:$0xff] }
  0x37   :  { %482 = vmatpush3.msra.mxu0 %v97_v2  ;;  %514 = vmatprep.subr.mxu1 %v198_v7  ;;  %v193_v17 = vld [vmem:[#allocation7 + $0x48] sm:$0xff]  ;;  %v192_v19 = vld [vmem:[#allocation7 + $0x40] sm:$0xff]  ;;  %v191_v21 = vld [vmem:[#allocation7 + $0x38] sm:$0xff] }
  0x38   :  { %483 = vmatprep.subr.mxu0 %v96_v3  ;;  %515 = vmatpush3.msra.mxu1 %v198_v7  ;;  %v89_v18 = vld [vmem:[#allocation5 + $0x28] sm:$0xff]  ;;  %v88_v20 = vld [vmem:[#allocation5 + $0x20] sm:$0xff]  ;;  %v87_v22 = vld [vmem:[#allocation5 + $0x18] sm:$0xff] }
  0x39   :  { %484 = vmatpush3.msra.mxu0 %v96_v3  ;;  %516 = vmatprep.subr.mxu1 %v197_v9  ;;  %v190_v23 = vld [vmem:[#allocation7 + $0x30] sm:$0xff]  ;;  %v189_v25 = vld [vmem:[#allocation7 + $0x28] sm:$0xff]  ;;  %v188_v27 = vld [vmem:[#allocation7 + $0x20] sm:$0xff] }
  0x3a   :  { %485 = vmatprep.subr.mxu0 %v95_v5  ;;  %517 = vmatpush3.msra.mxu1 %v197_v9  ;;  %v86_v24 = vld [vmem:[#allocation5 + $0x10] sm:$0xff]  ;;  %v85_v26 = vld [vmem:[#allocation5 + $0x8] sm:$0xff]  ;;  %v84_v28 = vld [vmem:[#allocation5] sm:$0xff] }
  0x3b   :  { %486 = vmatpush3.msra.mxu0 %v95_v5  ;;  %518 = vmatprep.subr.mxu1 %v196_v11  ;;  %v83_v29 = vld [vmem:[#allocation2 + $0x8] sm:$0xff]  ;;  %v186_v31 = vld [vmem:[#allocation7 + $0x10] sm:$0xff]  ;;  %v185_v32 = vld [vmem:[#allocation7 + $0x8] sm:$0xff] }
  0x3c   :  { %487 = vmatprep.subr.mxu0 %v94_v8  ;;  %519 = vmatpush3.msra.mxu1 %v196_v11  ;;  %v187_v30 = vld [vmem:[#allocation7 + $0x18] sm:$0xff]  ;;  %v184_v33 = vld [vmem:[#allocation7] sm:$0xff]  ;;  %v298_v35 = vld [vmem:[#allocation8 + $0x70] sm:$0xff] }
  0x3d   :  { %488 = vmatpush3.msra.mxu0 %v94_v8  ;;  %520 = vmatprep.subr.mxu1 %v195_v13  ;;  %v299_v34 = vld [vmem:[#allocation8 + $0x78] sm:$0xff]  ;;  %v297_v36 = vld [vmem:[#allocation8 + $0x68] sm:$0xff]  ;;  %v296_v37 = vld [vmem:[#allocation8 + $0x60] sm:$0xff] }
  0x3e   :  { %489 = vmatprep.subr.mxu0 %v93_v10  ;;  %521 = vmatpush3.msra.mxu1 %v195_v13  ;;  %v295_v38 = vld [vmem:[#allocation8 + $0x58] sm:$0xff]  ;;  %v294_v39 = vld [vmem:[#allocation8 + $0x50] sm:$0xff]  ;;  %v293_v40 = vld [vmem:[#allocation8 + $0x48] sm:$0xff] }
  0x3f   :  { %490 = vmatpush3.msra.mxu0 %v93_v10  ;;  %522 = vmatprep.subr.mxu1 %v194_v15  ;;  %v292_v41 = vld [vmem:[#allocation8 + $0x40] sm:$0xff]  ;;  %v291_v42 = vld [vmem:[#allocation8 + $0x38] sm:$0xff]  ;;  %v290_v43 = vld [vmem:[#allocation8 + $0x30] sm:$0xff] }
  0x40   :  { %491 = vmatprep.subr.mxu0 %v92_v12  ;;  %523 = vmatpush3.msra.mxu1 %v194_v15  ;;  %v289_v44 = vld [vmem:[#allocation8 + $0x28] sm:$0xff]  ;;  %v288_v45 = vld [vmem:[#allocation8 + $0x20] sm:$0xff]  ;;  %v420_v46 = vld [vmem:[%s793_s2] ss:$0 sm:$0xff]  ;;  %v394_v15 = vlaneseq }
  0x41   :  { %492 = vmatpush3.msra.mxu0 %v92_v12  ;;  %524 = vmatprep.subr.mxu1 %v193_v17  ;;  %v287_v53 = vld [vmem:[#allocation8 + $0x18] sm:$0xff]  ;;  %v286_v54 = vld [vmem:[#allocation8 + $0x10] sm:$0xff]  ;;  %v285_v55 = vld [vmem:[#allocation8 + $0x8] sm:$0xff] }
  0x42   :  { %493 = vmatprep.subr.mxu0 %v91_v14  ;;  %525 = vmatpush3.msra.mxu1 %v193_v17  ;;  %v284_v56 = vld [vmem:[#allocation8] sm:$0xff]  ;;  %v421_v57 = vld [vmem:[%s795_s4] ss:$0 sm:$0xff]  ;;  %s711_s4 = smov [#allocation10]  }
  0x43   :  { %494 = vmatpush3.msra.mxu0 %v91_v14  ;;  %526 = vmatprep.subr.mxu1 %v192_v19  ;;  %v422_v0 = vld [vmem:[%s797_s6] ss:$0 sm:$0xff]  ;;  %s406_s6 = sshll.u32 %s711_s4, 4  ;;  %s407_s6 = int_to_ptr.vmem [resolvable:$true] %s406_s6 }
  0x44   :  { %495 = vmatprep.subr.mxu0 %v90_v16  ;;  %527 = vmatpush3.msra.mxu1 %v192_v19  ;;  %s677_s24 = scalar_lea.vmem %s407_s6, 256  ;;  %p682_p7 = scmp.lt.s32.totalorder %s407_s6, %s407_s6 }
  0x45   :  { %496 = vmatpush3.msra.mxu0 %v90_v16  ;;  %528 = vmatprep.subr.mxu1 %v191_v21  ;;  %v395_v16 = vand.u32 127, %v394_v15  ;;  %p678_p6 = scmp.ne.s32.totalorder %s407_s6, %s677_s24  ;;  %p683_p8 = scmp.lt.s32.totalorder %s677_s24, %s677_s24 }
  0x46   :  { %497 = vmatprep.subr.mxu0 %v89_v18  ;;  %529 = vmatpush3.msra.mxu1 %v191_v21 }
  0x47   :  { %498 = vmatpush3.msra.mxu0 %v89_v18  ;;  %530 = vmatprep.subr.mxu1 %v190_v23  ;;  %vm396_vm0 = vcmp.lt.s32.totalorder %v395_v16, 4  ;;  %p684_p9 = por %p683_p8, %p682_p7 }
  0x48   :  { %499 = vmatprep.subr.mxu0 %v88_v20  ;;  %531 = vmatpush3.msra.mxu1 %v190_v23 }
  0x49   :  { %500 = vmatpush3.msra.mxu0 %v88_v20  ;;  %532 = vmatprep.subr.mxu1 %v189_v25  ;;  %p685_p10 = pnand %p684_p9, %p678_p6 }
  0x4a   :  { %501 = vmatprep.subr.mxu0 %v87_v22  ;;  %533 = vmatpush3.msra.mxu1 %v189_v25 }
  0x4b   :  { %502 = vmatpush3.msra.mxu0 %v87_v22  ;;  %534 = vmatprep.subr.mxu1 %v188_v27 }
  0x4c   :  { %503 = vmatprep.subr.mxu0 %v86_v24  ;;  %535 = vmatpush3.msra.mxu1 %v188_v27 }
  0x4d   :  { %504 = vmatpush3.msra.mxu0 %v86_v24  ;;  %536 = vmatprep.subr.mxu1 %v187_v30 }
  0x4e   :  { %505 = vmatprep.subr.mxu0 %v85_v26  ;;  %537 = vmatpush3.msra.mxu1 %v187_v30 }
  0x4f   :  { %506 = vmatpush3.msra.mxu0 %v85_v26  ;;  %538 = vmatprep.subr.mxu1 %v186_v31 }
  0x50   :  { %507 = vmatprep.subr.mxu0 %v84_v28  ;;  %539 = vmatpush3.msra.mxu1 %v186_v31 }
  0x51   :  { %508 = vmatpush3.msra.mxu0 %v84_v28  ;;  %540 = vmatprep.subr.mxu1 %v185_v32 }
  0x52   :  { %510 = vmatmul.mubr.f32.vlgmr.msra.gmra.mxu0 %v83_v29  ;;  %541 = vmatpush3.msra.mxu1 %v185_v32 }
  0x53   :  { %542 = vmatprep.subr.mxu1 %v184_v33  ;;  %547 = vmatprep.subr.mxu0 %v299_v34 }
  0x54   :  { %543 = vmatpush3.msra.mxu1 %v184_v33  ;;  %548 = vmatpush3.msra.mxu0 %v299_v34 }
  0x55   :  { %549 = vmatprep.subr.mxu0 %v298_v35 }
  0x56   :  { %550 = vmatpush3.msra.mxu0 %v298_v35 }
  0x57   :  { %551 = vmatprep.subr.mxu0 %v297_v36 }
  0x58   :  { %552 = vmatpush3.msra.mxu0 %v297_v36 }
  0x59   :  { %553 = vmatprep.subr.mxu0 %v296_v37 }
  0x5a   :  { %554 = vmatpush3.msra.mxu0 %v296_v37 }
  0x5b   :  { %555 = vmatprep.subr.mxu0 %v295_v38 }
  0x5c   :  { %556 = vmatpush3.msra.mxu0 %v295_v38 }
  0x5d   :  { %557 = vmatprep.subr.mxu0 %v294_v39 }
  0x5e   :  { %558 = vmatpush3.msra.mxu0 %v294_v39 }
  0x5f   :  { %559 = vmatprep.subr.mxu0 %v293_v40 }
  0x60   :  { %560 = vmatpush3.msra.mxu0 %v293_v40 }
  0x61   :  { %561 = vmatprep.subr.mxu0 %v292_v41 }
  0x62   :  { %562 = vmatpush3.msra.mxu0 %v292_v41 }
  0x63   :  { %563 = vmatprep.subr.mxu0 %v291_v42 }
  0x64   :  { %564 = vmatpush3.msra.mxu0 %v291_v42 }
  0x65   :  { %565 = vmatprep.subr.mxu0 %v290_v43 }
  0x66   :  { %566 = vmatpush3.msra.mxu0 %v290_v43 }
  0x67   :  { %567 = vmatprep.subr.mxu0 %v289_v44 }
  0x68   :  { %568 = vmatpush3.msra.mxu0 %v289_v44 }
  0x69   :  { %569 = vmatprep.subr.mxu0 %v288_v45 }
  0x6a   :  { %570 = vmatpush3.msra.mxu0 %v288_v45 }
  0x6b   :  { %571 = vmatprep.subr.mxu0 %v287_v53 }
  0x6c   :  { %572 = vmatpush3.msra.mxu0 %v287_v53 }
  0x6d   :  { %573 = vmatprep.subr.mxu0 %v286_v54 }
  0x6e   :  { %574 = vmatpush3.msra.mxu0 %v286_v54 }
  0x6f   :  { %575 = vmatprep.subr.mxu0 %v285_v55 }
  0x70   :  { %576 = vmatpush3.msra.mxu0 %v285_v55 }
  0x71   :  { %577 = vmatprep.subr.mxu0 %v284_v56 }
  0x72   :  { %578 = vmatpush3.msra.mxu0 %v284_v56 }
 0x112   :  { %v511_v47 = vpop.f32.mrf.mxu0 }
 0x113   :  { %v179_v48 = vadd.f32 %v511_v47, %v420_v46 }
 0x114   :  { %v173_v49 = vpop.f32.mrf.mxu0 }
 0x115   :  { %v174_v50 = vadd.f32 %v420_v46, %v173_v49  ;;  %v183_v52 = vmax.f32 %v179_v48, 0.0 }
 0x117   :  { %v182_v51 = vmax.f32 %v174_v50, 0.0 }
 0x119   :  { %544 = vmatprep.mubr.f32.mxu1 %v182_v51 }
 0x11a   :  { %545 = vmatmul.mubr.f32.vlgmr.msra.gmra.mxu1 %v183_v52 }
 0x1da   :  { %v546_v58 = vpop.f32.mrf.mxu1 }
 0x1db   :  { %v279_v59 = vadd.f32 %v546_v58, %v421_v57 }
 0x1dc   :  { %v273_v60 = vpop.f32.mrf.mxu1 }
 0x1dd   :  { %v274_v61 = vadd.f32 %v421_v57, %v273_v60  ;;  %v283_v63 = vmax.f32 %v279_v59, 0.0 }
 0x1df   :  { %v282_v62 = vmax.f32 %v274_v61, 0.0 }
 0x1e1   :  { %579 = vmatprep.mubr.f32.mxu0 %v282_v62 }
 0x1e2   :  { %580 = vmatmul.mubr.f32.vlgmr.msra.gmra.mxu0 %v283_v63 }
 0x2a2   :  { %v581_v1 = vpop.f32.mrf.mxu0 }
 0x2a3   :  { %v379_v2 = vadd.f32 %v581_v1, %v422_v0 }
 0x2a4   :  { %v373_v3 = vpop.f32.mrf.mxu0 }
 0x2a5   :  { %589 = vtanh.f32 %v379_v2  ;;  %v374_v4 = vadd.f32 %v422_v0, %v373_v3 }
 0x2a7   :  { %591 = vtanh.f32 %v374_v4 }
 0x2b2   :  { %v590_v5 = vpop.eup %589 }
 0x2b3   :  { %v385_v6 = vadd.f32 1.0, %v590_v5 }
 0x2b4   :  { %v592_v7 = vpop.eup %591 }
 0x2b5   :  { %v387_v8 = vmul.f32 6.0, %v385_v6  ;;  %v384_v9 = vadd.f32 1.0, %v592_v7 }
 0x2b7   :  { %v389_v10 = vadd.f32 -10.0, %v387_v8  ;;  %v386_v11 = vmul.f32 6.0, %v384_v9 }
 0x2b9   :  { %v392_v12 = vmul.f32 1.442695, %v389_v10  ;;  %v388_v13 = vadd.f32 -10.0, %v386_v11 }
 0x2bb   :  { %593 = vpow2.f32 %v392_v12  ;;  %v390_v14 = vmul.f32 1.442695, %v388_v13 }
 0x2bd   :  { %595 = vpow2.f32 %v390_v14 }
 0x2c8   :  { %v594_v17 = vpop.eup %593 }
 0x2c9   :  { %v398_v18 = vsel %vm396_vm0, %v379_v2, %v594_v17 }
 0x2ca   :  { %v596_v19 = vpop.eup %595  ;;  %400 = vst [vmem:[#allocation10 + $0x8] sm:$0xff] %v398_v18 }
 0x2cb   :  { %v397_v20 = vsel %vm396_vm0, %v374_v4, %v596_v19 }
 0x2cc   :  { %399 = vst [vmem:[#allocation10] sm:$0xff] %v397_v20 }
 0x2cd   :  { %688 = shalt.err (!%p685_p10)
}
 0x2ce   :  { %412 = dma.vmem_to_hbm [thread:$0]  %s407_s6, 256, %s798_s7, [#allocation4], %s707_s29, %s707_s29, %s708_s30  }
 0x2cf   :  { %703 = dma.done.wait [#allocation4], 256  }
 0x2d0   :  { %704 = vsyncadd [#allocation4], 4294967040 }
 0x2d1   :  { %416 = vsyncpa [#allocation3], 1 }
 0x2d2   :  { %417 = vsyncpa [#allocation6], 1 }
 0x2d3   :  { %418 = vsyncpa [#allocation9], 1 }
 0x2d4   :  { %419 = vsyncpa [#allocation4], 1 }

</bundles_post_ra>
